<compile_context>
chip_gen: v5e
topology: v5e:2x2
jax: 0.10.0
libtpu: 0.0.40
codegen_flags: <defaults>
</compile_context>

<pallas_src>
import numpy as np
import jax
import jax.numpy as jnp
from jax import lax
from jax.experimental import pallas as pl
from jax.experimental.pallas import tpu as pltpu


def _antialias_bilinear_matrix(in_size: int, out_size: int) -> np.ndarray:
    """Row-stochastic resize matrix matching torchvision bilinear w/ antialias.

    Triangle (linear) filter; when downscaling the filter support is widened by
    the scale factor (antialias). Half-pixel centers (align_corners=False);
    row renormalization reproduces torchvision's clamped-window behavior at
    the borders."""
    scale = in_size / out_size
    support = max(scale, 1.0)
    centers = (np.arange(out_size, dtype=np.float64) + 0.5) * scale   # (out,)
    src = np.arange(in_size, dtype=np.float64) + 0.5                  # (in,)
    dist = src[None, :] - centers[:, None]                            # (out, in)
    w = np.maximum(0.0, 1.0 - np.abs(dist) / support)
    w = w / np.sum(w, axis=1, keepdims=True)
    return w.astype(np.float32)


def _pick_h_tile(h_in: int, c: int, w_in: int, itemsize: int,
                 budget: int = 8 << 20, max_rows: int = 512) -> int:
    """Rows of H_in per reduction step so the (C, Ht, W_in) x-block fits `budget`.

    Ht is a multiple of 8 (f32 sublane tile) dividing H_in, so channel slices of
    the f32 intermediate are free views; falls back to the whole axis otherwise."""
    target = int(min(max_rows, max(8, budget // max(1, c * w_in * itemsize))))
    if h_in <= target:
        return h_in
    best = h_in   # fallback: whole reduction axis in one step (always legal)
    for t in range(8, target + 1, 8):
        if h_in % t == 0:
            best = t
    return best


def _pick_b_tile(n: int, per_image_bytes: int,
                 budget: int = 4 << 20, max_tile: int = 16) -> int:
    """Images per grid step: amortize per-step overhead for small images."""
    best = 1
    for d in range(1, min(n, max_tile) + 1):
        if n % d == 0 and d * per_image_bytes <= budget:
            best = d
    return best


def _resize_norm_kernel(scale_ref, bias_ref, x_ref, rht_ref, rwt_ref, o_ref, acc_ref):
    # scale_ref: (C,) f32 SMEM            = 1/std
    # bias_ref:  (C,) f32 SMEM            = -mean/std
    # x_ref:     (B_tile, C, Ht, W_in)    source dtype (bf16 cast happens here)
    # rht_ref:   (Ht, H_out) f32          Rh^T tile (H-contraction kept in f32)
    # rwt_ref:   (W_in, W_out) bf16       Rw^T
    # o_ref:     (B_tile, C, H_out, W_out) out_dtype
    # acc_ref:   (B_tile, C, H_out, W_out) f32 scratch, resident across the k axis
    B, C, Ht, W_in = x_ref.shape
    k = pl.program_id(1)

    @pl.when(k == 0)
    def _init():
        acc_ref[...] = jnp.zeros_like(acc_ref)

    # W-contraction: one big MXU matmul for all images/channels of this block.
    # bf16 operands, f32 accumulation; input cast to bf16 in-kernel (not in the wrapper).
    xb = x_ref[...].reshape(B * C * Ht, W_in).astype(jnp.bfloat16)
    tmp = jnp.dot(xb, rwt_ref[...],
                  preferred_element_type=jnp.float32)          # (B*C*Ht, W_out) f32

    rht = rht_ref[...]                                         # (Ht, H_out) f32
    for b in range(B):                                         # static & small
        for c in range(C):
            r0 = (b * C + c) * Ht
            t = tmp[r0:r0 + Ht, :]                             # (Ht, W_out) f32, 8-aligned slice
            # H-contraction in f32 (no bf16 re-cast of tmp): contract dim 0 of both.
            y = lax.dot_general(rht, t, (((0,), (0,)), ((), ())),
                                preferred_element_type=jnp.float32)   # (H_out, W_out)
            acc_ref[b, c] += y

    @pl.when(k == pl.num_programs(1) - 1)
    def _finalize():
        for b in range(B):
            for c in range(C):
                # Fused normalization (scalar broadcast from SMEM) + output cast.
                o_ref[b, c] = (acc_ref[b, c] * scale_ref[c]
                               + bias_ref[c]).astype(o_ref.dtype)


def preprocess_model(x: jax.Array, resize, mean, std, *,
                     out_dtype=jnp.bfloat16) -> jax.Array:
    """Equivalent of PreprocessingModel(resize, mean, std).forward(x), x in NCHW."""
    N, C, H_in, W_in = x.shape
    H_out, W_out = resize

    # Host-side, data-independent resize matrices.
    rh_np = _antialias_bilinear_matrix(H_in, H_out)            # (H_out, H_in)
    rw_np = _antialias_bilinear_matrix(W_in, W_out)            # (W_out, W_in)
    rht = jnp.asarray(rh_np.T, jnp.float32)                    # (H_in, H_out)  f32
    rwt = jnp.asarray(rw_np.T, jnp.bfloat16)                   # (W_in, W_out)  bf16

    mean = jnp.asarray(mean, jnp.float32).reshape(C)
    std = jnp.asarray(std, jnp.float32).reshape(C)
    inv_std = 1.0 / std                                        # (C,)
    bias = -mean * inv_std                                     # (C,)

    x_isz = jnp.dtype(x.dtype).itemsize
    o_isz = jnp.dtype(out_dtype).itemsize

    # Tiling: H_in reduction tiles (resolution-independent VMEM) and images per step.
    Ht = _pick_h_tile(H_in, C, W_in, x_isz)
    K = H_in // Ht
    B_tile = _pick_b_tile(N, C * Ht * W_in * x_isz)
    grid = (N // B_tile, K)

    # VMEM estimate: double-buffered blocks + f32 intermediates + accumulator.
    est = (2 * B_tile * C * Ht * W_in * x_isz            # x block
           + 2 * Ht * H_out * 4                          # rht block
           + 2 * W_in * W_out * 2                        # rwt block
           + 2 * B_tile * C * H_out * W_out * o_isz      # out block
           + B_tile * C * H_out * W_out * 4              # acc scratch
           + B_tile * C * Ht * W_out * 4                 # tmp (f32)
           + B_tile * C * Ht * W_in * 2)                 # bf16 copy of x block
    try:   # generation-aware cap: 128 MiB (v5e/v6e) vs 64 MiB (v7x) physical VMEM
        vmem_cap = int(getattr(pltpu.get_tpu_info(), "vmem_capacity_bytes", 64 << 20))
    except Exception:
        vmem_cap = 64 << 20
    vmem_limit = int(min((vmem_cap * 4) // 5, max(32 << 20, 2 * est)))

    out = pl.pallas_call(
        _resize_norm_kernel,
        out_shape=jax.ShapeDtypeStruct((N, C, H_out, W_out), out_dtype),
        grid=grid,
        in_specs=[
            pl.BlockSpec(memory_space=pltpu.MemorySpace.SMEM),               # inv_std (C,)
            pl.BlockSpec(memory_space=pltpu.MemorySpace.SMEM),               # bias    (C,)
            pl.BlockSpec((B_tile, C, Ht, W_in), lambda b, k: (b, 0, k, 0)),  # x
            pl.BlockSpec((Ht, H_out), lambda b, k: (k, 0)),                  # Rh^T tile
            pl.BlockSpec((W_in, W_out), lambda b, k: (0, 0)),                # Rw^T
        ],
        out_specs=pl.BlockSpec((B_tile, C, H_out, W_out), lambda b, k: (b, 0, 0, 0)),
        scratch_shapes=[pltpu.VMEM((B_tile, C, H_out, W_out), jnp.float32)],
        compiler_params=pltpu.CompilerParams(
            dimension_semantics=("parallel", "arbitrary"),
            vmem_limit_bytes=vmem_limit),
    )(inv_std, bias, x, rht, rwt)
    return out


if __name__ == "__main__":
    key = jax.random.PRNGKey(0)

    # Small shapes consistent with the module: NCHW RGB image batch.
    N, C, H_in, W_in = 2, 3, 16, 16
    resize = (8, 8)
    mean = jnp.array([0.485, 0.456, 0.406], jnp.float32)
    std = jnp.array([0.229, 0.224, 0.225], jnp.float32)

    x = jax.random.uniform(key, (N, C, H_in, W_in), dtype=jnp.float32)

    out = preprocess_model(x, resize, mean, std)     # bf16 output by default
    jax.block_until_ready(out)
    assert out.shape == (N, C, resize[0], resize[1]), out.shape

    # Pure-JAX f32 reference. Remaining kernel error: bf16 x / Rw^T operands of the
    # first matmul and the bf16 output cast (H-contraction is f32).
    rh_f = jnp.asarray(_antialias_bilinear_matrix(H_in, resize[0]))
    rw_f = jnp.asarray(_antialias_bilinear_matrix(W_in, resize[1]))
    ref = jnp.einsum('oh,nchw,pw->ncop', rh_f, x, rw_f)
    ref = (ref - mean[None, :, None, None]) / std[None, :, None, None]
    err = float(jnp.max(jnp.abs(out.astype(jnp.float32) - ref)))
    assert err < 0.1, f"max abs error too large: {err}"

    print("KERNEL_OK")
</pallas_src>

<mosaic_0001>
module attributes {stable_mosaic.version = 11 : i64} {
  func.func @_resize_norm_kernel(%arg0: i32, %arg1: i32, %arg2: memref<3xf32, #tpu.memory_space<smem>>, %arg3: memref<3xf32, #tpu.memory_space<smem>>, %arg4: memref<2x3x16x16xf32, #tpu.memory_space<vmem>>, %arg5: memref<16x8xf32, #tpu.memory_space<vmem>>, %arg6: memref<16x8xbf16, #tpu.memory_space<vmem>>, %arg7: memref<2x3x8x8xbf16, #tpu.memory_space<vmem>>, %arg8: memref<2x3x8x8xf32, #tpu.memory_space<vmem>>) attributes {dimension_semantics = [#tpu.dimension_semantics<parallel>, #tpu.dimension_semantics<arbitrary>], iteration_bounds = array<i64: 1, 1>, scalar_prefetch = 0 : i64, scratch_operands = 1 : i64, tpu.core_type = #tpu.core_type<tc>, window_params = [{transform_indices = @transform_0, window_bounds = array<i64: 3>}, {transform_indices = @transform_1, window_bounds = array<i64: 3>}, {transform_indices = @transform_2, window_bounds = array<i64: 2, 3, 16, 16>}, {transform_indices = @transform_3, window_bounds = array<i64: 16, 8>}, {pipeline_mode = #tpu.pipeline_mode<synchronous>, transform_indices = @transform_4, window_bounds = array<i64: 16, 8>}, {transform_indices = @transform_5, window_bounds = array<i64: 2, 3, 8, 8>}]} {
    %c0_i32 = arith.constant 0 : i32
    %0 = arith.cmpi eq, %arg1, %c0_i32 : i32
    %1 = arith.extui %0 : i1 to i32
    %c0_i32_0 = arith.constant 0 : i32
    %2 = arith.cmpi ne, %1, %c0_i32_0 : i32
    scf.if %2 {
      %cst_62 = arith.constant 0.000000e+00 : f32
      %60 = vector.broadcast %cst_62 : f32 to vector<2x3x8x8xf32>
      %c0_63 = arith.constant 0 : index
      %c0_64 = arith.constant 0 : index
      %c0_65 = arith.constant 0 : index
      %c0_66 = arith.constant 0 : index
      %61 = vector.load %arg8[%c0_63, %c0_64, %c0_65, %c0_66] : memref<2x3x8x8xf32, #tpu.memory_space<vmem>>, vector<2x3x8x8xf32>
      tpu.vector_store %arg8[%c0_63, %c0_64, %c0_65, %c0_66], %60 {strides = array<i32>} : memref<2x3x8x8xf32, #tpu.memory_space<vmem>>, vector<2x3x8x8xf32>,
    } else {
    }
    %c0 = arith.constant 0 : index
    %c0_1 = arith.constant 0 : index
    %c0_2 = arith.constant 0 : index
    %c0_3 = arith.constant 0 : index
    %3 = vector.load %arg4[%c0, %c0_1, %c0_2, %c0_3] : memref<2x3x16x16xf32, #tpu.memory_space<vmem>>, vector<2x3x16x16xf32>
    %4 = vector.shape_cast %3 : vector<2x3x16x16xf32> to vector<96x16xf32>
    %5 = arith.truncf %4 : vector<96x16xf32> to vector<96x16xbf16>
    %c0_4 = arith.constant 0 : index
    %c0_5 = arith.constant 0 : index
    %6 = vector.load %arg6[%c0_4, %c0_5] : memref<16x8xbf16, #tpu.memory_space<vmem>>, vector<16x8xbf16>
    %cst = arith.constant dense<0.000000e+00> : vector<96x8xf32>
    %7 = tpu.matmul %5, %6, %cst {dimension_numbers = #tpu.dot_dimension_numbers<[1], [0], [0], [1], [0, 0, 1, 1], [], []>} : vector<96x16xbf16>, vector<16x8xbf16>, vector<96x8xf32> -> vector<96x8xf32>
    %c0_6 = arith.constant 0 : index
    %c0_7 = arith.constant 0 : index
    %8 = vector.load %arg5[%c0_6, %c0_7] : memref<16x8xf32, #tpu.memory_space<vmem>>, vector<16x8xf32>
    %9 = vector.extract_strided_slice %7 {offsets = [0, 0], sizes = [16, 8], strides = [1, 1]} : vector<96x8xf32> to vector<16x8xf32>
    %cst_8 = arith.constant dense<0.000000e+00> : vector<8x8xf32>
    %10 = tpu.matmul %8, %9, %cst_8 {dimension_numbers = #tpu.dot_dimension_numbers<[0], [0], [1], [1], [0, 1, 1, 1], [], []>} : vector<16x8xf32>, vector<16x8xf32>, vector<8x8xf32> -> vector<8x8xf32>
    %c0_9 = arith.constant 0 : index
    %c0_10 = arith.constant 0 : index
    %c0_11 = arith.constant 0 : index
    %c0_12 = arith.constant 0 : index
    %11 = vector.load %arg8[%c0_9, %c0_10, %c0_11, %c0_12] : memref<2x3x8x8xf32, #tpu.memory_space<vmem>>, vector<1x1x8x8xf32>
    %12 = vector.shape_cast %11 : vector<1x1x8x8xf32> to vector<8x8xf32>
    %13 = arith.addf %12, %10 : vector<8x8xf32>
    %c0_13 = arith.constant 0 : index
    %c0_14 = arith.constant 0 : index
    %c0_15 = arith.constant 0 : index
    %c0_16 = arith.constant 0 : index
    %14 = vector.load %arg8[%c0_13, %c0_14, %c0_15, %c0_16] : memref<2x3x8x8xf32, #tpu.memory_space<vmem>>, vector<1x1x8x8xf32>
    %15 = vector.shape_cast %14 : vector<1x1x8x8xf32> to vector<8x8xf32>
    %16 = vector.shape_cast %13 : vector<8x8xf32> to vector<1x1x8x8xf32>
    tpu.vector_store %arg8[%c0_13, %c0_14, %c0_15, %c0_16], %16 {strides = array<i32>} : memref<2x3x8x8xf32, #tpu.memory_space<vmem>>, vector<1x1x8x8xf32>,
    %17 = vector.extract_strided_slice %7 {offsets = [16, 0], sizes = [16, 8], strides = [1, 1]} : vector<96x8xf32> to vector<16x8xf32>
    %cst_17 = arith.constant dense<0.000000e+00> : vector<8x8xf32>
    %18 = tpu.matmul %8, %17, %cst_17 {dimension_numbers = #tpu.dot_dimension_numbers<[0], [0], [1], [1], [0, 1, 1, 1], [], []>} : vector<16x8xf32>, vector<16x8xf32>, vector<8x8xf32> -> vector<8x8xf32>
    %c0_18 = arith.constant 0 : index
    %c1 = arith.constant 1 : index
    %c0_19 = arith.constant 0 : index
    %c0_20 = arith.constant 0 : index
    %19 = vector.load %arg8[%c0_18, %c1, %c0_19, %c0_20] : memref<2x3x8x8xf32, #tpu.memory_space<vmem>>, vector<1x1x8x8xf32>
    %20 = vector.shape_cast %19 : vector<1x1x8x8xf32> to vector<8x8xf32>
    %21 = arith.addf %20, %18 : vector<8x8xf32>
    %c0_21 = arith.constant 0 : index
    %c1_22 = arith.constant 1 : index
    %c0_23 = arith.constant 0 : index
    %c0_24 = arith.constant 0 : index
    %22 = vector.load %arg8[%c0_21, %c1_22, %c0_23, %c0_24] : memref<2x3x8x8xf32, #tpu.memory_space<vmem>>, vector<1x1x8x8xf32>
    %23 = vector.shape_cast %22 : vector<1x1x8x8xf32> to vector<8x8xf32>
    %24 = vector.shape_cast %21 : vector<8x8xf32> to vector<1x1x8x8xf32>
    tpu.vector_store %arg8[%c0_21, %c1_22, %c0_23, %c0_24], %24 {strides = array<i32>} : memref<2x3x8x8xf32, #tpu.memory_space<vmem>>, vector<1x1x8x8xf32>,
    %25 = vector.extract_strided_slice %7 {offsets = [32, 0], sizes = [16, 8], strides = [1, 1]} : vector<96x8xf32> to vector<16x8xf32>
    %cst_25 = arith.constant dense<0.000000e+00> : vector<8x8xf32>
    %26 = tpu.matmul %8, %25, %cst_25 {dimension_numbers = #tpu.dot_dimension_numbers<[0], [0], [1], [1], [0, 1, 1, 1], [], []>} : vector<16x8xf32>, vector<16x8xf32>, vector<8x8xf32> -> vector<8x8xf32>
    %c0_26 = arith.constant 0 : index
    %c2 = arith.constant 2 : index
    %c0_27 = arith.constant 0 : index
    %c0_28 = arith.constant 0 : index
    %27 = vector.load %arg8[%c0_26, %c2, %c0_27, %c0_28] : memref<2x3x8x8xf32, #tpu.memory_space<vmem>>, vector<1x1x8x8xf32>
    %28 = vector.shape_cast %27 : vector<1x1x8x8xf32> to vector<8x8xf32>
    %29 = arith.addf %28, %26 : vector<8x8xf32>
    %c0_29 = arith.constant 0 : index
    %c2_30 = arith.constant 2 : index
    %c0_31 = arith.constant 0 : index
    %c0_32 = arith.constant 0 : index
    %30 = vector.load %arg8[%c0_29, %c2_30, %c0_31, %c0_32] : memref<2x3x8x8xf32, #tpu.memory_space<vmem>>, vector<1x1x8x8xf32>
    %31 = vector.shape_cast %30 : vector<1x1x8x8xf32> to vector<8x8xf32>
    %32 = vector.shape_cast %29 : vector<8x8xf32> to vector<1x1x8x8xf32>
    tpu.vector_store %arg8[%c0_29, %c2_30, %c0_31, %c0_32], %32 {strides = array<i32>} : memref<2x3x8x8xf32, #tpu.memory_space<vmem>>, vector<1x1x8x8xf32>,
    %33 = vector.extract_strided_slice %7 {offsets = [48, 0], sizes = [16, 8], strides = [1, 1]} : vector<96x8xf32> to vector<16x8xf32>
    %cst_33 = arith.constant dense<0.000000e+00> : vector<8x8xf32>
    %34 = tpu.matmul %8, %33, %cst_33 {dimension_numbers = #tpu.dot_dimension_numbers<[0], [0], [1], [1], [0, 1, 1, 1], [], []>} : vector<16x8xf32>, vector<16x8xf32>, vector<8x8xf32> -> vector<8x8xf32>
    %c1_34 = arith.constant 1 : index
    %c0_35 = arith.constant 0 : index
    %c0_36 = arith.constant 0 : index
    %c0_37 = arith.constant 0 : index
    %35 = vector.load %arg8[%c1_34, %c0_35, %c0_36, %c0_37] : memref<2x3x8x8xf32, #tpu.memory_space<vmem>>, vector<1x1x8x8xf32>
    %36 = vector.shape_cast %35 : vector<1x1x8x8xf32> to vector<8x8xf32>
    %37 = arith.addf %36, %34 : vector<8x8xf32>
    %c1_38 = arith.constant 1 : index
    %c0_39 = arith.constant 0 : index
    %c0_40 = arith.constant 0 : index
    %c0_41 = arith.constant 0 : index
    %38 = vector.load %arg8[%c1_38, %c0_39, %c0_40, %c0_41] : memref<2x3x8x8xf32, #tpu.memory_space<vmem>>, vector<1x1x8x8xf32>
    %39 = vector.shape_cast %38 : vector<1x1x8x8xf32> to vector<8x8xf32>
    %40 = vector.shape_cast %37 : vector<8x8xf32> to vector<1x1x8x8xf32>
    tpu.vector_store %arg8[%c1_38, %c0_39, %c0_40, %c0_41], %40 {strides = array<i32>} : memref<2x3x8x8xf32, #tpu.memory_space<vmem>>, vector<1x1x8x8xf32>,
    %41 = vector.extract_strided_slice %7 {offsets = [64, 0], sizes = [16, 8], strides = [1, 1]} : vector<96x8xf32> to vector<16x8xf32>
    %cst_42 = arith.constant dense<0.000000e+00> : vector<8x8xf32>
    %42 = tpu.matmul %8, %41, %cst_42 {dimension_numbers = #tpu.dot_dimension_numbers<[0], [0], [1], [1], [0, 1, 1, 1], [], []>} : vector<16x8xf32>, vector<16x8xf32>, vector<8x8xf32> -> vector<8x8xf32>
    %c1_43 = arith.constant 1 : index
    %c1_44 = arith.constant 1 : index
    %c0_45 = arith.constant 0 : index
    %c0_46 = arith.constant 0 : index
    %43 = vector.load %arg8[%c1_43, %c1_44, %c0_45, %c0_46] : memref<2x3x8x8xf32, #tpu.memory_space<vmem>>, vector<1x1x8x8xf32>
    %44 = vector.shape_cast %43 : vector<1x1x8x8xf32> to vector<8x8xf32>
    %45 = arith.addf %44, %42 : vector<8x8xf32>
    %c1_47 = arith.constant 1 : index
    %c1_48 = arith.constant 1 : index
    %c0_49 = arith.constant 0 : index
    %c0_50 = arith.constant 0 : index
    %46 = vector.load %arg8[%c1_47, %c1_48, %c0_49, %c0_50] : memref<2x3x8x8xf32, #tpu.memory_space<vmem>>, vector<1x1x8x8xf32>
    %47 = vector.shape_cast %46 : vector<1x1x8x8xf32> to vector<8x8xf32>
    %48 = vector.shape_cast %45 : vector<8x8xf32> to vector<1x1x8x8xf32>
    tpu.vector_store %arg8[%c1_47, %c1_48, %c0_49, %c0_50], %48 {strides = array<i32>} : memref<2x3x8x8xf32, #tpu.memory_space<vmem>>, vector<1x1x8x8xf32>,
    %49 = vector.extract_strided_slice %7 {offsets = [80, 0], sizes = [16, 8], strides = [1, 1]} : vector<96x8xf32> to vector<16x8xf32>
    %cst_51 = arith.constant dense<0.000000e+00> : vector<8x8xf32>
    %50 = tpu.matmul %8, %49, %cst_51 {dimension_numbers = #tpu.dot_dimension_numbers<[0], [0], [1], [1], [0, 1, 1, 1], [], []>} : vector<16x8xf32>, vector<16x8xf32>, vector<8x8xf32> -> vector<8x8xf32>
    %c1_52 = arith.constant 1 : index
    %c2_53 = arith.constant 2 : index
    %c0_54 = arith.constant 0 : index
    %c0_55 = arith.constant 0 : index
    %51 = vector.load %arg8[%c1_52, %c2_53, %c0_54, %c0_55] : memref<2x3x8x8xf32, #tpu.memory_space<vmem>>, vector<1x1x8x8xf32>
    %52 = vector.shape_cast %51 : vector<1x1x8x8xf32> to vector<8x8xf32>
    %53 = arith.addf %52, %50 : vector<8x8xf32>
    %c1_56 = arith.constant 1 : index
    %c2_57 = arith.constant 2 : index
    %c0_58 = arith.constant 0 : index
    %c0_59 = arith.constant 0 : index
    %54 = vector.load %arg8[%c1_56, %c2_57, %c0_58, %c0_59] : memref<2x3x8x8xf32, #tpu.memory_space<vmem>>, vector<1x1x8x8xf32>
    %55 = vector.shape_cast %54 : vector<1x1x8x8xf32> to vector<8x8xf32>
    %56 = vector.shape_cast %53 : vector<8x8xf32> to vector<1x1x8x8xf32>
    tpu.vector_store %arg8[%c1_56, %c2_57, %c0_58, %c0_59], %56 {strides = array<i32>} : memref<2x3x8x8xf32, #tpu.memory_space<vmem>>, vector<1x1x8x8xf32>,
    %c0_i32_60 = arith.constant 0 : i32
    %57 = arith.cmpi eq, %arg1, %c0_i32_60 : i32
    %58 = arith.extui %57 : i1 to i32
    %c0_i32_61 = arith.constant 0 : i32
    %59 = arith.cmpi ne, %58, %c0_i32_61 : i32
    scf.if %59 {
      %c0_62 = arith.constant 0 : index
      %c0_63 = arith.constant 0 : index
      %c0_64 = arith.constant 0 : index
      %c0_65 = arith.constant 0 : index
      %60 = vector.load %arg8[%c0_62, %c0_63, %c0_64, %c0_65] : memref<2x3x8x8xf32, #tpu.memory_space<vmem>>, vector<1x1x8x8xf32>
      %61 = vector.shape_cast %60 : vector<1x1x8x8xf32> to vector<8x8xf32>
      %c0_66 = arith.constant 0 : index
      %62 = memref.load %arg2[%c0_66] : memref<3xf32, #tpu.memory_space<smem>>
      %63 = vector.broadcast %62 : f32 to vector<8x8xf32>
      %64 = arith.mulf %61, %63 : vector<8x8xf32>
      %c0_67 = arith.constant 0 : index
      %65 = memref.load %arg3[%c0_67] : memref<3xf32, #tpu.memory_space<smem>>
      %66 = vector.broadcast %65 : f32 to vector<8x8xf32>
      %67 = arith.addf %64, %66 : vector<8x8xf32>
      %68 = arith.truncf %67 : vector<8x8xf32> to vector<8x8xbf16>
      %c0_68 = arith.constant 0 : index
      %c0_69 = arith.constant 0 : index
      %c0_70 = arith.constant 0 : index
      %c0_71 = arith.constant 0 : index
      %69 = vector.load %arg7[%c0_68, %c0_69, %c0_70, %c0_71] : memref<2x3x8x8xbf16, #tpu.memory_space<vmem>>, vector<1x1x8x8xbf16>
      %70 = vector.shape_cast %69 : vector<1x1x8x8xbf16> to vector<8x8xbf16>
      %71 = vector.shape_cast %68 : vector<8x8xbf16> to vector<1x1x8x8xbf16>
      tpu.vector_store %arg7[%c0_68, %c0_69, %c0_70, %c0_71], %71 {strides = array<i32>} : memref<2x3x8x8xbf16, #tpu.memory_space<vmem>>, vector<1x1x8x8xbf16>,
      %c0_72 = arith.constant 0 : index
      %c1_73 = arith.constant 1 : index
      %c0_74 = arith.constant 0 : index
      %c0_75 = arith.constant 0 : index
      %72 = vector.load %arg8[%c0_72, %c1_73, %c0_74, %c0_75] : memref<2x3x8x8xf32, #tpu.memory_space<vmem>>, vector<1x1x8x8xf32>
      %73 = vector.shape_cast %72 : vector<1x1x8x8xf32> to vector<8x8xf32>
      %c1_76 = arith.constant 1 : index
      %74 = memref.load %arg2[%c1_76] : memref<3xf32, #tpu.memory_space<smem>>
      %75 = vector.broadcast %74 : f32 to vector<8x8xf32>
      %76 = arith.mulf %73, %75 : vector<8x8xf32>
      %c1_77 = arith.constant 1 : index
      %77 = memref.load %arg3[%c1_77] : memref<3xf32, #tpu.memory_space<smem>>
      %78 = vector.broadcast %77 : f32 to vector<8x8xf32>
      %79 = arith.addf %76, %78 : vector<8x8xf32>
      %80 = arith.truncf %79 : vector<8x8xf32> to vector<8x8xbf16>
      %c0_78 = arith.constant 0 : index
      %c1_79 = arith.constant 1 : index
      %c0_80 = arith.constant 0 : index
      %c0_81 = arith.constant 0 : index
      %81 = vector.load %arg7[%c0_78, %c1_79, %c0_80, %c0_81] : memref<2x3x8x8xbf16, #tpu.memory_space<vmem>>, vector<1x1x8x8xbf16>
      %82 = vector.shape_cast %81 : vector<1x1x8x8xbf16> to vector<8x8xbf16>
      %83 = vector.shape_cast %80 : vector<8x8xbf16> to vector<1x1x8x8xbf16>
      tpu.vector_store %arg7[%c0_78, %c1_79, %c0_80, %c0_81], %83 {strides = array<i32>} : memref<2x3x8x8xbf16, #tpu.memory_space<vmem>>, vector<1x1x8x8xbf16>,
      %c0_82 = arith.constant 0 : index
      %c2_83 = arith.constant 2 : index
      %c0_84 = arith.constant 0 : index
      %c0_85 = arith.constant 0 : index
      %84 = vector.load %arg8[%c0_82, %c2_83, %c0_84, %c0_85] : memref<2x3x8x8xf32, #tpu.memory_space<vmem>>, vector<1x1x8x8xf32>
      %85 = vector.shape_cast %84 : vector<1x1x8x8xf32> to vector<8x8xf32>
      %c2_86 = arith.constant 2 : index
      %86 = memref.load %arg2[%c2_86] : memref<3xf32, #tpu.memory_space<smem>>
      %87 = vector.broadcast %86 : f32 to vector<8x8xf32>
      %88 = arith.mulf %85, %87 : vector<8x8xf32>
      %c2_87 = arith.constant 2 : index
      %89 = memref.load %arg3[%c2_87] : memref<3xf32, #tpu.memory_space<smem>>
      %90 = vector.broadcast %89 : f32 to vector<8x8xf32>
      %91 = arith.addf %88, %90 : vector<8x8xf32>
      %92 = arith.truncf %91 : vector<8x8xf32> to vector<8x8xbf16>
      %c0_88 = arith.constant 0 : index
      %c2_89 = arith.constant 2 : index
      %c0_90 = arith.constant 0 : index
      %c0_91 = arith.constant 0 : index
      %93 = vector.load %arg7[%c0_88, %c2_89, %c0_90, %c0_91] : memref<2x3x8x8xbf16, #tpu.memory_space<vmem>>, vector<1x1x8x8xbf16>
      %94 = vector.shape_cast %93 : vector<1x1x8x8xbf16> to vector<8x8xbf16>
      %95 = vector.shape_cast %92 : vector<8x8xbf16> to vector<1x1x8x8xbf16>
      tpu.vector_store %arg7[%c0_88, %c2_89, %c0_90, %c0_91], %95 {strides = array<i32>} : memref<2x3x8x8xbf16, #tpu.memory_space<vmem>>, vector<1x1x8x8xbf16>,
      %c1_92 = arith.constant 1 : index
      %c0_93 = arith.constant 0 : index
      %c0_94 = arith.constant 0 : index
      %c0_95 = arith.constant 0 : index
      %96 = vector.load %arg8[%c1_92, %c0_93, %c0_94, %c0_95] : memref<2x3x8x8xf32, #tpu.memory_space<vmem>>, vector<1x1x8x8xf32>
      %97 = vector.shape_cast %96 : vector<1x1x8x8xf32> to vector<8x8xf32>
      %c0_96 = arith.constant 0 : index
      %98 = memref.load %arg2[%c0_96] : memref<3xf32, #tpu.memory_space<smem>>
      %99 = vector.broadcast %98 : f32 to vector<8x8xf32>
      %100 = arith.mulf %97, %99 : vector<8x8xf32>
      %c0_97 = arith.constant 0 : index
      %101 = memref.load %arg3[%c0_97] : memref<3xf32, #tpu.memory_space<smem>>
      %102 = vector.broadcast %101 : f32 to vector<8x8xf32>
      %103 = arith.addf %100, %102 : vector<8x8xf32>
      %104 = arith.truncf %103 : vector<8x8xf32> to vector<8x8xbf16>
      %c1_98 = arith.constant 1 : index
      %c0_99 = arith.constant 0 : index
      %c0_100 = arith.constant 0 : index
      %c0_101 = arith.constant 0 : index
      %105 = vector.load %arg7[%c1_98, %c0_99, %c0_100, %c0_101] : memref<2x3x8x8xbf16, #tpu.memory_space<vmem>>, vector<1x1x8x8xbf16>
      %106 = vector.shape_cast %105 : vector<1x1x8x8xbf16> to vector<8x8xbf16>
      %107 = vector.shape_cast %104 : vector<8x8xbf16> to vector<1x1x8x8xbf16>
      tpu.vector_store %arg7[%c1_98, %c0_99, %c0_100, %c0_101], %107 {strides = array<i32>} : memref<2x3x8x8xbf16, #tpu.memory_space<vmem>>, vector<1x1x8x8xbf16>,
      %c1_102 = arith.constant 1 : index
      %c1_103 = arith.constant 1 : index
      %c0_104 = arith.constant 0 : index
      %c0_105 = arith.constant 0 : index
      %108 = vector.load %arg8[%c1_102, %c1_103, %c0_104, %c0_105] : memref<2x3x8x8xf32, #tpu.memory_space<vmem>>, vector<1x1x8x8xf32>
      %109 = vector.shape_cast %108 : vector<1x1x8x8xf32> to vector<8x8xf32>
      %c1_106 = arith.constant 1 : index
      %110 = memref.load %arg2[%c1_106] : memref<3xf32, #tpu.memory_space<smem>>
      %111 = vector.broadcast %110 : f32 to vector<8x8xf32>
      %112 = arith.mulf %109, %111 : vector<8x8xf32>
      %c1_107 = arith.constant 1 : index
      %113 = memref.load %arg3[%c1_107] : memref<3xf32, #tpu.memory_space<smem>>
      %114 = vector.broadcast %113 : f32 to vector<8x8xf32>
      %115 = arith.addf %112, %114 : vector<8x8xf32>
      %116 = arith.truncf %115 : vector<8x8xf32> to vector<8x8xbf16>
      %c1_108 = arith.constant 1 : index
      %c1_109 = arith.constant 1 : index
      %c0_110 = arith.constant 0 : index
      %c0_111 = arith.constant 0 : index
      %117 = vector.load %arg7[%c1_108, %c1_109, %c0_110, %c0_111] : memref<2x3x8x8xbf16, #tpu.memory_space<vmem>>, vector<1x1x8x8xbf16>
      %118 = vector.shape_cast %117 : vector<1x1x8x8xbf16> to vector<8x8xbf16>
      %119 = vector.shape_cast %116 : vector<8x8xbf16> to vector<1x1x8x8xbf16>
      tpu.vector_store %arg7[%c1_108, %c1_109, %c0_110, %c0_111], %119 {strides = array<i32>} : memref<2x3x8x8xbf16, #tpu.memory_space<vmem>>, vector<1x1x8x8xbf16>,
      %c1_112 = arith.constant 1 : index
      %c2_113 = arith.constant 2 : index
      %c0_114 = arith.constant 0 : index
      %c0_115 = arith.constant 0 : index
      %120 = vector.load %arg8[%c1_112, %c2_113, %c0_114, %c0_115] : memref<2x3x8x8xf32, #tpu.memory_space<vmem>>, vector<1x1x8x8xf32>
      %121 = vector.shape_cast %120 : vector<1x1x8x8xf32> to vector<8x8xf32>
      %c2_116 = arith.constant 2 : index
      %122 = memref.load %arg2[%c2_116] : memref<3xf32, #tpu.memory_space<smem>>
      %123 = vector.broadcast %122 : f32 to vector<8x8xf32>
      %124 = arith.mulf %121, %123 : vector<8x8xf32>
      %c2_117 = arith.constant 2 : index
      %125 = memref.load %arg3[%c2_117] : memref<3xf32, #tpu.memory_space<smem>>
      %126 = vector.broadcast %125 : f32 to vector<8x8xf32>
      %127 = arith.addf %124, %126 : vector<8x8xf32>
      %128 = arith.truncf %127 : vector<8x8xf32> to vector<8x8xbf16>
      %c1_118 = arith.constant 1 : index
      %c2_119 = arith.constant 2 : index
      %c0_120 = arith.constant 0 : index
      %c0_121 = arith.constant 0 : index
      %129 = vector.load %arg7[%c1_118, %c2_119, %c0_120, %c0_121] : memref<2x3x8x8xbf16, #tpu.memory_space<vmem>>, vector<1x1x8x8xbf16>
      %130 = vector.shape_cast %129 : vector<1x1x8x8xbf16> to vector<8x8xbf16>
      %131 = vector.shape_cast %128 : vector<8x8xbf16> to vector<1x1x8x8xbf16>
      tpu.vector_store %arg7[%c1_118, %c2_119, %c0_120, %c0_121], %131 {strides = array<i32>} : memref<2x3x8x8xbf16, #tpu.memory_space<vmem>>, vector<1x1x8x8xbf16>,
    } else {
    }
    return
  }
  func.func @transform_0(%arg0: i32, %arg1: i32) -> i32 {
    %c0_i32 = arith.constant 0 : i32
    %c0_i32_0 = arith.constant 0 : i32
    return %c0_i32 : i32
  }
  func.func @transform_1(%arg0: i32, %arg1: i32) -> i32 {
    %c0_i32 = arith.constant 0 : i32
    %c0_i32_0 = arith.constant 0 : i32
    return %c0_i32 : i32
  }
  func.func @transform_2(%arg0: i32, %arg1: i32) -> (i32, i32, i32, i32) {
    %c0_i32 = arith.constant 0 : i32
    %c0_i32_0 = arith.constant 0 : i32
    %c0_i32_1 = arith.constant 0 : i32
    return %arg0, %c0_i32, %arg1, %c0_i32_0 : i32, i32, i32, i32
  }
  func.func @transform_3(%arg0: i32, %arg1: i32) -> (i32, i32) {
    %c0_i32 = arith.constant 0 : i32
    %c0_i32_0 = arith.constant 0 : i32
    return %arg1, %c0_i32 : i32, i32
  }
  func.func @transform_4(%arg0: i32, %arg1: i32) -> (i32, i32) {
    %c0_i32 = arith.constant 0 : i32
    %c0_i32_0 = arith.constant 0 : i32
    %c0_i32_1 = arith.constant 0 : i32
    return %c0_i32, %c0_i32_0 : i32, i32
  }
  func.func @transform_5(%arg0: i32, %arg1: i32) -> (i32, i32, i32, i32) {
    %c0_i32 = arith.constant 0 : i32
    %c0_i32_0 = arith.constant 0 : i32
    %c0_i32_1 = arith.constant 0 : i32
    %c0_i32_2 = arith.constant 0 : i32
    return %arg0, %c0_i32, %c0_i32_0, %c0_i32_1 : i32, i32, i32, i32
  }
}

</mosaic_0001>

<bundles_post_ra>
// kernel: tpu_custom_call.1
= control target key start
LH: loop header
LB: loop body
LE: loop exit
PB: predicated region body
PF: predicated region fallthrough
CT: control target
= control target key end

     0   :  { %10 = vsyncpa [#allocation6], 0  ;;  %s647_s0 = inlined_call_operand.vmem [shape: f32[3], index: 0, kind: input, shape index: {}]   ;;  %s648_s1 = inlined_call_operand.vmem [shape: f32[3], index: 1, kind: input, shape index: {}]   ;;  %s649_s2 = inlined_call_operand.hbm [shape: f32[2,3,16,16], index: 2, kind: input, shape index: {}]   ;;  %s650_s3 = inlined_call_operand.vmem [shape: f32[16,8], index: 3, kind: input, shape index: {}]   ;;  %s651_s4 = inlined_call_operand.vmem [shape: bf16[16,8], index: 4, kind: input, shape index: {}]   ;;  %s652_s5 = inlined_call_operand.hbm [shape: bf16[2,3,8,8], index: 5, kind: output, shape index: {}]  }
   0x1   :  { %11 = vsyncpa [#allocation8], 0 }
   0x2   :  { %12 = vsyncpa [#allocation4], 0 }
   0x3   :  { %13 = vsyncpa [#allocation5], 0  ;;  %s19_s20 = sshll.u32 %s647_s0, 4  ;;  %s28_s23 = sshll.u32 %s648_s1, 4  ;;  %s20_s20 = int_to_ptr.vmem [resolvable:$true] %s19_s20  ;;  %s29_s23 = int_to_ptr.vmem [resolvable:$true] %s28_s23 }
   0x4   :  { %s539_s24 = smov [#allocation3]   ;;  %s540_s25 = smov [#allocation7]  }
   0x5   :  { %22 = dma.vmem_to_smem %s20_s20, 16, %s539_s24, [#allocation6]  }
   0x6   :  { %31 = dma.vmem_to_smem %s29_s23, 16, %s540_s25, [#allocation8]  }
   0x7   :  { %s36_s28 = sshll.u32 %s649_s2, 4  ;;  %s541_s29 = smov [#allocation9]   ;;  %s37_s28 = int_to_ptr.hbm [resolvable:$true] %s36_s28 }
   0x8   :  { %s38_s30 = sshll.u32 %s541_s29, 4  ;;  %s542_s6 = smov 128   ;;  %s39_s30 = int_to_ptr.vmem [resolvable:$true] %s38_s30 }
   0x9   :  { %s543_s0 = smov 8  }
   0xa   :  { %44 = dma.hbm_to_vmem [thread:$0]  %s37_s28, 1536, %s39_s30, [#allocation4], %s542_s6, %s542_s6, %s543_s0  }
   0xb   :  { %531 = dma.done.wait [#allocation6], 16  }
   0xc   :  { %532 = vsyncadd [#allocation6], 4294967280 }
   0xd   :  { %533 = dma.done.wait [#allocation8], 16  }
   0xe   :  { %534 = vsyncadd [#allocation8], 4294967280 }
   0xf   :  { %535 = dma.done.wait [#allocation4], 1536  }
  0x10   :  { %536 = vsyncadd [#allocation4], 4294965760 }
  0x11   :  { %61 = sfence }
  0x12   :  { %v447_v0 = vld [vmem:[%s651_s4] sm:$0xff]  ;;  %v74_v1 = vld [vmem:[#allocation9] sm:$0xff]  ;;  %v75_v2 = vld [vmem:[#allocation9 + $0x8] sm:$0xff]  ;;  %vm100_vm0 = vcmask 130048   ;;  %vm67_vm1 = vcmask 64512   ;;  %v544_v27 = vmov 0.0  }
  0x13   :  { %v86_v3 = vpack.c.bf16 %v75_v2, %v74_v1  ;;  %v158_v4 = vld [vmem:[%s650_s3] sm:$0xff]  ;;  %126 = vmatpush.bf16.msra.mxu0 %v447_v0  ;;  %v82_v5 = vld [vmem:[#allocation9 + $0x40] sm:$0xff]  ;;  %v83_v6 = vld [vmem:[#allocation9 + $0x48] sm:$0xff]  ;;  %449 = vmatpush.bf16.msra.mxu2 %v447_v0  ;;  %68 = vst.msk [vmem:[#allocation2] sm:$0xff] %vm67_vm1, %v544_v27  ;;  %s616_s10 = sld [smem:[#allocation7]]  ;;  %vm350_vm2 = vcmask 60416  }
  0x14   :  { %160 = vxpose.xlu0.b32.start [1/2] (short) (narrow) %v158_v4, 8  ;;  %v90_v7 = vpack.c.bf16 %v83_v6, %v82_v5  ;;  %448 = vmatpush.bf16.msra.mxu1 %v447_v0  ;;  %v80_v8 = vld [vmem:[#allocation9 + $0x30] sm:$0xff]  ;;  %v81_v9 = vld [vmem:[#allocation9 + $0x38] sm:$0xff]  ;;  %v78_v18 = vld [vmem:[#allocation9 + $0x20] sm:$0xff]  ;;  %69 = vst.msk [vmem:[#allocation2 + $0x8] sm:$0xff] %vm67_vm1, %v544_v27  ;;  %s619_s11 = sld [smem:[#allocation3 + $0x1]] }
  0x15   :  { %v89_v10 = vpack.c.bf16 %v81_v9, %v80_v8  ;;  %v159_v11 = vld [vmem:[%s650_s3 + $0x8] sm:$0xff]  ;;  %v76_v12 = vld [vmem:[#allocation9 + $0x10] sm:$0xff]  ;;  %v79_v19 = vld [vmem:[#allocation9 + $0x28] sm:$0xff]  ;;  %70 = vst.msk [vmem:[#allocation2 + $0x10] sm:$0xff] %vm67_vm1, %v544_v27  ;;  %s614_s3 = sld [smem:[#allocation3]]  ;;  %s545_s15 = smov [#allocation10]  }
  0x16   :  { %427 = vmatmul.msk.bf16.vlgmr.msra.gmra.mxu0 %vm100_vm0, %v86_v3  ;;  %431 = vmatmul.msk.bf16.vlgmr.msra.gmra.mxu2 %vm100_vm0, %v90_v7  ;;  %v77_v13 = vld [vmem:[#allocation9 + $0x18] sm:$0xff]  ;;  %v84_v14 = vld [vmem:[#allocation9 + $0x50] sm:$0xff]  ;;  %v88_v20 = vpack.c.bf16 %v79_v19, %v78_v18  ;;  %71 = vst.msk [vmem:[#allocation2 + $0x18] sm:$0xff] %vm67_vm1, %v544_v27  ;;  %s622_s12 = sld [smem:[#allocation7 + $0x1]]  ;;  %s406_s16 = sshll.u32 %s545_s15, 4  ;;  %s407_s16 = int_to_ptr.vmem [resolvable:$true] %s406_s16 }
  0x17   :  { %430 = vmatmul.msk.bf16.vlgmr.msra.gmra.mxu1 %vm100_vm0, %v89_v10  ;;  %v85_v15 = vld [vmem:[#allocation9 + $0x58] sm:$0xff]  ;;  %v87_v16 = vpack.c.bf16 %v77_v13, %v76_v12  ;;  %72 = vst.msk [vmem:[#allocation2 + $0x20] sm:$0xff] %vm67_vm1, %v544_v27  ;;  %s628_s13 = sld [smem:[#allocation3 + $0x2]]  ;;  %s408_s19 = sshll.u32 %s652_s5, 4  ;;  %s409_s19 = int_to_ptr.hbm [resolvable:$true] %s408_s19 }
  0x18   :  { %v91_v17 = vpack.c.bf16 %v85_v15, %v84_v14  ;;  %73 = vst.msk [vmem:[#allocation2 + $0x28] sm:$0xff] %vm67_vm1, %v544_v27  ;;  %s631_s14 = sld [smem:[#allocation7 + $0x2]]  ;;  %s546_s20 = smov 64  }
  0x19   :  { %v347_v46 = vstv %s616_s10  ;;  %s547_s21 = smov 4  }
  0x1a   :  { %v215_v35 = vld [vmem:[#allocation2] sm:$0xff]  ;;  %v354_v52 = vstv %s619_s11 }
  0x1b   :  { %v240_v38 = vld [vmem:[#allocation2 + $0x8] sm:$0xff]  ;;  %v344_v43 = vstv %s614_s3 }
  0x1c   :  { %161 = vxpose.xlu0.b32.end [2/2] (short) (narrow) %v159_v11, 8  ;;  %v264_v48 = vld [vmem:[#allocation2 + $0x10] sm:$0xff]  ;;  %v357_v58 = vstv %s622_s12 }
  0x1d   :  { %v288_v40 = vld [vmem:[#allocation2 + $0x18] sm:$0xff]  ;;  %v364_v3 = vstv %s628_s13 }
  0x1e   :  { %v312_v49 = vld [vmem:[#allocation2 + $0x20] sm:$0xff]  ;;  %v367_v7 = vstv %s631_s14 }
  0x1f   :  { %v336_v63 = vld [vmem:[#allocation2 + $0x28] sm:$0xff] }
  0x26   :  { %428 = vmatmul.msk.bf16.gmra.mxu0 %vm100_vm0, %v87_v16  ;;  %432 = vmatmul.msk.bf16.gmra.mxu2 %vm100_vm0, %v91_v17 }
  0x36   :  { %429 = vmatmul.msk.bf16.gmra.mxu0 %vm100_vm0, %v88_v20 }
  0x93   :  { %v128_v21 = vpop.f32.mrf.mxu0 }
  0x94   :  { %v143_v22 = vpop.f32.mrf.mxu1 }
  0x99   :  { %v148_v25 = vpop.f32.mrf.mxu2 }
  0x9b   :  { %v130_v23 = vpop.f32.mrf.mxu0 }
  0x9c   :  { %209 = vmatpush.msrb.mxu1 %v130_v23  ;;  %v145_v24 = vpop.f32.mrf.mxu1 }
  0x9e   :  { %210 = vmatpush.msrb.mxu1 %v128_v21 }
  0xa0   :  { %281 = vmatpush.msra.mxu1 %v145_v24 }
  0xa1   :  { %v150_v28 = vpop.f32.mrf.mxu2 }
  0xa2   :  { %282 = vmatpush.msra.mxu1 %v143_v22 }
  0xa3   :  { %v133_v26 = vpop.f32.mrf.mxu0 }
  0xa9   :  { %v153_v31 = vpop.f32.mrf.mxu2 }
  0xab   :  { %v135_v29 = vpop.f32.mrf.mxu0 }
  0xac   :  { %233 = vmatpush.msrb.mxu2 %v135_v29 }
  0xae   :  { %234 = vmatpush.msrb.mxu2 %v133_v26 }
  0xb0   :  { %305 = vmatpush.msra.mxu2 %v150_v28 }
  0xb1   :  { %v155_v34 = vpop.f32.mrf.mxu2 }
  0xb2   :  { %306 = vmatpush.msra.mxu2 %v148_v25 }
  0xb3   :  { %v138_v30 = vpop.f32.mrf.mxu0 }
  0xb8   :  { %v176_v32 = vpop.trf.xlu0 }
  0xb9   :  { %433 = vmatmul.msk.f32.vlgmr.msrb.gmra.mxu1 %vm100_vm0, %v176_v32  ;;  %434 = vmatmul.msk.f32.vlgmr.msrb.gmra.mxu2 %vm100_vm0, %v176_v32 }
  0xbb   :  { %v140_v33 = vpop.f32.mrf.mxu0 }
  0xbc   :  { %257 = vmatpush.msra.mxu3 %v140_v33 }
  0xbe   :  { %258 = vmatpush.msra.mxu3 %v138_v30 }
  0xbf   :  { %435 = vmatmul.msk.f32.vlgmr.msra.gmra.mxu3 %vm100_vm0, %v176_v32 }
  0xc0   :  { %329 = vmatpush.msrb.mxu3 %v155_v34 }
  0xc1   :  { %436 = vmatmul.msk.f32.vlgmr.msra.gmra.mxu1 %vm100_vm0, %v176_v32  ;;  %437 = vmatmul.msk.f32.vlgmr.msra.gmra.mxu2 %vm100_vm0, %v176_v32 }
  0xc2   :  { %330 = vmatpush.msrb.mxu3 %v153_v31 }
  0xc7   :  { %438 = vmatmul.msk.f32.vlgmr.msrb.gmra.mxu3 %vm100_vm0, %v176_v32 }
 0x136   :  { %v212_v36 = vpop.f32.mrf.mxu1 }
 0x137   :  { %v216_v37 = vadd.f32 %v215_v35, %v212_v36 }
 0x139   :  { %218 = vst.msk [vmem:[#allocation2] sm:$0xff] %vm67_vm1, %v216_v37 }
 0x13c   :  { %v236_v39 = vpop.f32.mrf.mxu2 }
 0x13d   :  { %v241_v41 = vadd.f32 %v240_v38, %v236_v39 }
 0x13e   :  { %v284_v42 = vpop.f32.mrf.mxu1 }
 0x13f   :  { %242 = vst.msk [vmem:[#allocation2 + $0x8] sm:$0xff] %vm67_vm1, %v241_v41  ;;  %v289_v44 = vadd.f32 %v288_v40, %v284_v42 }
 0x140   :  { %v342_v45 = vld [vmem:[#allocation2] sm:$0xff] }
 0x141   :  { %290 = vst.msk [vmem:[#allocation2 + $0x18] sm:$0xff] %vm67_vm1, %v289_v44  ;;  %v345_v47 = vmul.f32 %v344_v43, %v342_v45 }
 0x142   :  { %v260_v51 = vpop.f32.mrf.mxu3 }
 0x143   :  { %v348_v50 = vadd.f32 %v347_v46, %v345_v47  ;;  %v265_v53 = vadd.f32 %v264_v48, %v260_v51 }
 0x144   :  { %v308_v54 = vpop.f32.mrf.mxu2 }
 0x145   :  { %v349_v55 = vpack.c.bf16 %v348_v50, %v348_v50  ;;  %v313_v56 = vadd.f32 %v312_v49, %v308_v54  ;;  %266 = vst.msk [vmem:[#allocation2 + $0x10] sm:$0xff] %vm67_vm1, %v265_v53 }
 0x146   :  { %v352_v57 = vld [vmem:[#allocation2 + $0x8] sm:$0xff] }
 0x147   :  { %v355_v59 = vmul.f32 %v354_v52, %v352_v57  ;;  %314 = vst.msk [vmem:[#allocation2 + $0x20] sm:$0xff] %vm67_vm1, %v313_v56 }
 0x148   :  { %v372_v60 = vld [vmem:[#allocation2 + $0x18] sm:$0xff]  ;;  %351 = vst.msk [vmem:[#allocation10] sm:$0xf] %vm350_vm2, %v349_v55 }
 0x149   :  { %v358_v61 = vadd.f32 %v357_v58, %v355_v59  ;;  %v375_v62 = vmul.f32 %v372_v60, %v344_v43 }
 0x14a   :  { %v332_v2 = vpop.f32.mrf.mxu3 }
 0x14b   :  { %v359_v0 = vpack.c.bf16 %v358_v61, %v358_v61  ;;  %v378_v1 = vadd.f32 %v375_v62, %v347_v46  ;;  %v337_v4 = vadd.f32 %v336_v63, %v332_v2 }
 0x14c   :  { %v362_v6 = vld [vmem:[#allocation2 + $0x10] sm:$0xff] }
 0x14d   :  { %361 = vst.msk [vmem:[#allocation10 + $0x4] sm:$0xf] %vm350_vm2, %v359_v0  ;;  %v379_v5 = vpack.c.bf16 %v378_v1, %v378_v1  ;;  %v365_v8 = vmul.f32 %v364_v3, %v362_v6 }
 0x14e   :  { %338 = vst.msk [vmem:[#allocation2 + $0x28] sm:$0xff] %vm67_vm1, %v337_v4  ;;  %v382_v9 = vld [vmem:[#allocation2 + $0x20] sm:$0xff] }
 0x14f   :  { %381 = vst.msk [vmem:[#allocation10 + $0xc] sm:$0xf] %vm350_vm2, %v379_v5  ;;  %v385_v10 = vmul.f32 %v382_v9, %v354_v52  ;;  %v368_v11 = vadd.f32 %v367_v7, %v365_v8 }
 0x151   :  { %v388_v12 = vadd.f32 %v385_v10, %v357_v58  ;;  %v369_v13 = vpack.c.bf16 %v368_v11, %v368_v11 }
 0x153   :  { %v389_v14 = vpack.c.bf16 %v388_v12, %v388_v12  ;;  %371 = vst.msk [vmem:[#allocation10 + $0x8] sm:$0xf] %vm350_vm2, %v369_v13 }
 0x155   :  { %391 = vst.msk [vmem:[#allocation10 + $0x10] sm:$0xf] %vm350_vm2, %v389_v14  ;;  %v392_v15 = vld [vmem:[#allocation2 + $0x28] sm:$0xff] }
 0x156   :  { %v395_v16 = vmul.f32 %v392_v15, %v364_v3 }
 0x158   :  { %v398_v17 = vadd.f32 %v395_v16, %v367_v7 }
 0x15a   :  { %v399_v18 = vpack.c.bf16 %v398_v17, %v398_v17 }
 0x15c   :  { %401 = vst.msk [vmem:[#allocation10 + $0x14] sm:$0xf] %vm350_vm2, %v399_v18 }
 0x15d   :  { %414 = dma.vmem_to_hbm [thread:$0]  %s407_s16, 384, %s409_s19, [#allocation5], %s546_s20, %s546_s20, %s547_s21  }
 0x15e   :  { %537 = dma.done.wait [#allocation5], 384  }
 0x15f   :  { %538 = vsyncadd [#allocation5], 4294966912 }
 0x160   :  { %419 = vsyncpa [#allocation4], 1 }
 0x161   :  { %420 = vsyncpa [#allocation5], 1 }
 0x162   :  { %421 = vsyncpa [#allocation6], 1 }
 0x163   :  { %422 = vsyncpa [#allocation8], 1 }

</bundles_post_ra>
